<compile_context>
chip_gen: v7x
topology: tpu7x:2x2x1
jax: 0.10.0
libtpu: 0.0.40
codegen_flags: <defaults>
</compile_context>

<pallas_src>
import functools
from typing import NamedTuple

import jax
import jax.numpy as jnp
from jax.experimental import pallas as pl
from jax.experimental.pallas import tpu as pltpu

_LANE = 128


def _cdiv(a: int, b: int) -> int:
    return -(-a // b)


def _round_up(a: int, m: int) -> int:
    return _cdiv(a, m) * m


def _pad2(a, rows: int, cols: int):
    """Zero-pad a 2-D array up to (rows, cols) (no-op when already there)."""
    pr, pc = rows - a.shape[0], cols - a.shape[1]
    if pr == 0 and pc == 0:
        return a
    return jnp.pad(a, ((0, pr), (0, pc)))


@functools.lru_cache(maxsize=1)
def _vmem_cap_bytes() -> int:
    """Generation-aware VMEM request ceiling (leaves Mosaic scratch headroom)."""
    try:
        cap = int(pltpu.get_tpu_info().vmem_capacity_bytes)
    except Exception:  # interpret mode / query unavailable: conservative default
        return 48 * 1024 * 1024
    # ~80% of physical, never more than 100 MiB:
    #   v5e/v6e (128 MiB) -> 100 MiB, v7x (64 MiB) -> ~51 MiB.
    return min(100 * 1024 * 1024, int(cap * 0.8))


def _pick_batch_tile(B: int) -> int:
    """Batch-tile rows: multiple of 16; ~512 rows for large B, but always
    >= 2 grid steps when B allows so the parallel grid axis can be split
    across v7x's two TensorCores; sized to keep batch padding waste small."""
    if B <= 32:
        return max(16, _round_up(B, 16))
    n_steps = max(2, _cdiv(B, 512))
    return _round_up(_cdiv(B, n_steps), 16)


def _layernorm_padded(h, gamma, beta, n_actual: int, eps: float = 1e-5):
    """nn.LayerNorm over a lane-padded last dim.

    Padded lanes of `h`, gamma and beta are zero.  Shifted (two-pass) variance
    with an explicit lane mask -> exact statistics, no catastrophic
    cancellation, and the output stays zero in padded lanes.
    """
    n_padded = h.shape[-1]
    mean = jnp.sum(h, axis=-1, keepdims=True) / n_actual
    centered = h - mean
    if n_padded != n_actual:
        lane = jax.lax.broadcasted_iota(jnp.int32, (1, n_padded), 1)
        centered = jnp.where(lane < n_actual, centered, 0.0)
    var = jnp.sum(centered * centered, axis=-1, keepdims=True) / n_actual
    return centered * jax.lax.rsqrt(var + eps) * gamma + beta


def _make_kernel(use_ln: bool, has_skip: bool, in_dim: int, out_dim: int):
    """Pallas kernel body for one batch tile, given the static configuration."""

    def kernel(*refs):
        it = iter(refs)
        x_ref = next(it)
        if use_ln:
            ln1_g_ref, ln1_b_ref = next(it), next(it)
        w1_ref, b1_ref = next(it), next(it)
        if use_ln:
            ln2_g_ref, ln2_b_ref = next(it), next(it)
        w2_ref, b2_ref = next(it), next(it)
        ws_ref = next(it) if has_skip else None
        o_ref = next(it)

        x_in = x_ref[...]                        # native dtype (f32 or bf16)
        x = x_in.astype(jnp.float32)             # LN/ReLU math in f32 (v5e VPU)

        # ---- main branch: f32 elementwise, bf16 MXU operands, f32 accum ----
        h = x
        if use_ln:
            h = _layernorm_padded(h, ln1_g_ref[...], ln1_b_ref[...], in_dim)
        h = jnp.maximum(h, 0.0)
        h = jnp.dot(h.astype(jnp.bfloat16), w1_ref[...],
                    preferred_element_type=jnp.float32) + b1_ref[...]
        if use_ln:
            h = _layernorm_padded(h, ln2_g_ref[...], ln2_b_ref[...], out_dim)
        h = jnp.maximum(h, 0.0)
        h = jnp.dot(h.astype(jnp.bfloat16), w2_ref[...],
                    preferred_element_type=jnp.float32) + b2_ref[...]

        # ---- skip branch ----------------------------------------------------
        if has_skip:
            skip = jnp.dot(x_in.astype(jnp.bfloat16), ws_ref[...],
                           preferred_element_type=jnp.float32)
        else:
            skip = x                              # in_p == out_p here

        o_ref[...] = (h + skip).astype(o_ref.dtype)   # output in x.dtype

    return kernel


# ----------------------------------------------------------------------------
# Parameters
# ----------------------------------------------------------------------------
def init_residual_block_params(key, in_dim, out_dim, use_ln=False):
    """Deterministic synthetic parameters (shapes match nn.Linear / nn.LayerNorm)."""
    ks = jax.random.split(key, 5)
    s1, s2 = 1.0 / jnp.sqrt(in_dim), 1.0 / jnp.sqrt(out_dim)
    p = {
        "w1": jax.random.uniform(ks[0], (in_dim, out_dim), jnp.float32, -s1, s1),
        "b1": jax.random.uniform(ks[1], (1, out_dim), jnp.float32, -s1, s1),
        "w2": jax.random.uniform(ks[2], (out_dim, out_dim), jnp.float32, -s2, s2),
        "b2": jax.random.uniform(ks[3], (1, out_dim), jnp.float32, -s2, s2),
    }
    if use_ln:
        p["ln1_g"] = jnp.ones((1, in_dim), jnp.float32)
        p["ln1_b"] = jnp.zeros((1, in_dim), jnp.float32)
        p["ln2_g"] = jnp.ones((1, out_dim), jnp.float32)
        p["ln2_b"] = jnp.zeros((1, out_dim), jnp.float32)
    if in_dim != out_dim:
        p["ws"] = jax.random.uniform(ks[4], (in_dim, out_dim), jnp.float32, -s1, s1)
    return p


class PreparedParams(NamedTuple):
    arrays: dict
    in_dim: int
    out_dim: int
    use_ln: bool
    has_skip: bool


def prepare_residual_block_params(params, use_ln=False) -> PreparedParams:
    """One-time repack, hoisted out of the per-call path: pad feature dims to
    multiples of 128, cast matmul weights to bf16, keep biases/LN params f32."""
    in_dim, out_dim = params["w1"].shape
    in_p, out_p = _round_up(in_dim, _LANE), _round_up(out_dim, _LANE)
    has_skip = "ws" in params
    f32, bf16 = jnp.float32, jnp.bfloat16
    a = {
        "w1": _pad2(params["w1"], in_p, out_p).astype(bf16),
        "b1": _pad2(params["b1"], 1, out_p).astype(f32),
        "w2": _pad2(params["w2"], out_p, out_p).astype(bf16),
        "b2": _pad2(params["b2"], 1, out_p).astype(f32),
    }
    if use_ln:
        a["ln1_g"] = _pad2(params["ln1_g"], 1, in_p).astype(f32)
        a["ln1_b"] = _pad2(params["ln1_b"], 1, in_p).astype(f32)
        a["ln2_g"] = _pad2(params["ln2_g"], 1, out_p).astype(f32)
        a["ln2_b"] = _pad2(params["ln2_b"], 1, out_p).astype(f32)
    if has_skip:
        a["ws"] = _pad2(params["ws"], in_p, out_p).astype(bf16)
    return PreparedParams(a, in_dim, out_dim, use_ln, has_skip)


# ----------------------------------------------------------------------------
# Forward
# ----------------------------------------------------------------------------
def residual_block_forward(x, prepared: PreparedParams):
    """Pallas forward pass of ResidualBlock. x: (B, in_dim) -> (B, out_dim)."""
    return _forward_impl(x, prepared.arrays, prepared.in_dim, prepared.out_dim,
                         prepared.use_ln, prepared.has_skip)


@functools.partial(jax.jit, static_argnums=(2, 3, 4, 5))
def _forward_impl(x, arrays, in_dim, out_dim, use_ln, has_skip):
    B = x.shape[0]
    in_p, out_p = _round_up(in_dim, _LANE), _round_up(out_dim, _LANE)
    itemsize = jnp.dtype(x.dtype).itemsize

    # bf16 weight bytes; Pallas double-buffers every input (even constant
    # index_map blocks), so they are counted 2x in the VMEM estimate below.
    weight_bytes = 2 * (in_p * out_p + out_p * out_p
                        + (in_p * out_p if has_skip else 0))
    small_bytes = 4 * (2 * out_p + (2 * in_p + 2 * out_p if use_ln else 0))

    vmem_cap = _vmem_cap_bytes()
    TB = _pick_batch_tile(B)

    def vmem_est(tb):
        return 2 * (weight_bytes + small_bytes
                    + tb * in_p * itemsize + tb * out_p * itemsize)

    while TB > 16 and vmem_est(TB) > vmem_cap:
        TB = max(16, _round_up(TB // 2, 16))
    B_p = _round_up(B, TB)
    n_b = B_p // TB

    # DMA x in its native dtype (upcast inside the kernel); skip the wrapper
    # pad entirely when the shapes are already tile-aligned (fast path).
    x_p = x if (B_p == B and in_p == in_dim) else _pad2(x, B_p, in_p)

    resident = lambda i: (0, 0)   # weights/biases: same block every grid step
    # NOTE: pipeline_mode=pl.Buffered(1) on these resident specs would halve
    # their VMEM footprint on v7x; kept on default buffering for portability
    # and accounted for as 2x in vmem_est instead.

    operands = [x_p]
    in_specs = [pl.BlockSpec((TB, in_p), lambda i: (i, 0))]
    if use_ln:
        operands += [arrays["ln1_g"], arrays["ln1_b"]]
        in_specs += [pl.BlockSpec((1, in_p), resident)] * 2
    operands += [arrays["w1"], arrays["b1"]]
    in_specs += [pl.BlockSpec((in_p, out_p), resident),
                 pl.BlockSpec((1, out_p), resident)]
    if use_ln:
        operands += [arrays["ln2_g"], arrays["ln2_b"]]
        in_specs += [pl.BlockSpec((1, out_p), resident)] * 2
    operands += [arrays["w2"], arrays["b2"]]
    in_specs += [pl.BlockSpec((out_p, out_p), resident),
                 pl.BlockSpec((1, out_p), resident)]
    if has_skip:
        operands += [arrays["ws"]]
        in_specs += [pl.BlockSpec((in_p, out_p), resident)]

    kernel = _make_kernel(use_ln, has_skip, in_dim, out_dim)

    matmul_flops = 2 * B_p * (in_p * out_p + out_p * out_p
                              + (in_p * out_p if has_skip else 0))
    bytes_accessed = (weight_bytes + small_bytes
                      + B_p * in_p * itemsize + B_p * out_p * itemsize)
    cost = pl.CostEstimate(flops=matmul_flops,
                           transcendentals=(2 * B_p if use_ln else 0),
                           bytes_accessed=bytes_accessed)

    vmem_limit = int(min(vmem_cap, max(32 * 1024 * 1024, 2 * vmem_est(TB))))

    out_padded = pl.pallas_call(
        kernel,
        out_shape=jax.ShapeDtypeStruct((B_p, out_p), x.dtype),  # bf16 in -> bf16 out
        grid=(n_b,),
        in_specs=in_specs,
        out_specs=pl.BlockSpec((TB, out_p), lambda i: (i, 0)),
        compiler_params=pltpu.CompilerParams(
            dimension_semantics=("parallel",),   # megacore sharding on v7x
            vmem_limit_bytes=vmem_limit),
        cost_estimate=cost,
    )(*operands)

    if B_p == B and out_p == out_dim:
        return out_padded                         # aligned fast path: no slice
    return out_padded[:B, :out_dim]


# ----------------------------------------------------------------------------
# Pure-JAX reference and self-test
# ----------------------------------------------------------------------------
def residual_block_reference(x, params, use_ln=False):
    x = x.astype(jnp.float32)

    def ln(h, g, b, eps=1e-5):
        mean = jnp.mean(h, axis=-1, keepdims=True)
        var = jnp.mean((h - mean) ** 2, axis=-1, keepdims=True)
        return (h - mean) * jax.lax.rsqrt(var + eps) * g + b

    h = x
    if use_ln:
        h = ln(h, params["ln1_g"], params["ln1_b"])
    h = jnp.maximum(h, 0.0)
    h = h @ params["w1"] + params["b1"]
    if use_ln:
        h = ln(h, params["ln2_g"], params["ln2_b"])
    h = jnp.maximum(h, 0.0)
    h = h @ params["w2"] + params["b2"]
    skip = x @ params["ws"] if "ws" in params else x
    return h + skip


if __name__ == "__main__":
    keys = jax.random.split(jax.random.PRNGKey(0), 8)
    # bf16 matmul operands with f32 accumulation -> loosened tolerances vs f32 ref.
    ATOL = RTOL = 3e-2

    # Case 1: in_dim != out_dim (skip = Linear, no bias), no LN, tiny batch.
    B, in_dim, out_dim = 8, 32, 64
    x1 = jax.random.normal(keys[0], (B, in_dim), jnp.float32)
    p1 = init_residual_block_params(keys[1], in_dim, out_dim, use_ln=False)
    pp1 = prepare_residual_block_params(p1, use_ln=False)
    out1 = jax.block_until_ready(residual_block_forward(x1, pp1))
    ref1 = residual_block_reference(x1, p1, use_ln=False)
    assert out1.shape == (B, out_dim) and out1.dtype == x1.dtype
    assert jnp.allclose(out1, ref1, atol=ATOL, rtol=RTOL)

    # Case 2: in_dim == out_dim (skip = Identity), LayerNorm on.
    dim = 32
    x2 = jax.random.normal(keys[2], (B, dim), jnp.float32)
    p2 = init_residual_block_params(keys[3], dim, dim, use_ln=True)
    pp2 = prepare_residual_block_params(p2, use_ln=True)
    out2 = jax.block_until_ready(residual_block_forward(x2, pp2))
    ref2 = residual_block_reference(x2, p2, use_ln=True)
    assert out2.shape == (B, dim)
    assert jnp.allclose(out2, ref2, atol=ATOL, rtol=RTOL)

    # Case 3: multi-step batch grid + lane/batch padding + masked-LN path
    # (B=300 -> TB=160, B_p=320, grid=(2,); dims padded 96->128, 160->256).
    B3, in3, out3 = 300, 96, 160
    x3 = jax.random.normal(keys[4], (B3, in3), jnp.float32)
    p3 = init_residual_block_params(keys[5], in3, out3, use_ln=True)
    pp3 = prepare_residual_block_params(p3, use_ln=True)
    out3_ = jax.block_until_ready(residual_block_forward(x3, pp3))
    ref3 = residual_block_reference(x3, p3, use_ln=True)
    assert out3_.shape == (B3, out3)
    assert jnp.allclose(out3_, ref3, atol=ATOL, rtol=RTOL)

    # Case 4: bf16 in -> bf16 out, fully aligned fast path (no pad/slice/cast),
    # grid=(2,) so both v7x TensorCores get work.
    B4, dim4 = 64, 128
    x4 = jax.random.normal(keys[6], (B4, dim4), jnp.float32).astype(jnp.bfloat16)
    p4 = init_residual_block_params(keys[7], dim4, dim4, use_ln=True)
    pp4 = prepare_residual_block_params(p4, use_ln=True)
    out4 = jax.block_until_ready(residual_block_forward(x4, pp4))
    assert out4.shape == (B4, dim4) and out4.dtype == jnp.bfloat16
    ref4 = residual_block_reference(x4, p4, use_ln=True)
    assert jnp.allclose(out4.astype(jnp.float32), ref4, atol=1e-1, rtol=1e-1)

    print("KERNEL_OK")
</pallas_src>

<mosaic_0001>
module attributes {stable_mosaic.version = 11 : i64} {
  func.func @kernel(%arg0: i32, %arg1: memref<16x128xf32, #tpu.memory_space<vmem>>, %arg2: memref<128x128xbf16, #tpu.memory_space<vmem>>, %arg3: memref<1x128xf32, #tpu.memory_space<vmem>>, %arg4: memref<128x128xbf16, #tpu.memory_space<vmem>>, %arg5: memref<1x128xf32, #tpu.memory_space<vmem>>, %arg6: memref<128x128xbf16, #tpu.memory_space<vmem>>, %arg7: memref<16x128xf32, #tpu.memory_space<vmem>>) attributes {dimension_semantics = [#tpu.dimension_semantics<parallel>], iteration_bounds = array<i64: 1>, scalar_prefetch = 0 : i64, scratch_operands = 0 : i64, tpu.core_type = #tpu.core_type<tc>, window_params = [{transform_indices = @transform_0, window_bounds = array<i64: 16, 128>}, {pipeline_mode = #tpu.pipeline_mode<synchronous>, transform_indices = @transform_1, window_bounds = array<i64: 128, 128>}, {pipeline_mode = #tpu.pipeline_mode<synchronous>, transform_indices = @transform_2, window_bounds = array<i64: 1, 128>}, {pipeline_mode = #tpu.pipeline_mode<synchronous>, transform_indices = @transform_3, window_bounds = array<i64: 128, 128>}, {pipeline_mode = #tpu.pipeline_mode<synchronous>, transform_indices = @transform_4, window_bounds = array<i64: 1, 128>}, {pipeline_mode = #tpu.pipeline_mode<synchronous>, transform_indices = @transform_5, window_bounds = array<i64: 128, 128>}, {transform_indices = @transform_6, window_bounds = array<i64: 16, 128>}]} {
    %c0 = arith.constant 0 : index
    %c0_0 = arith.constant 0 : index
    %0 = vector.load %arg1[%c0, %c0_0] : memref<16x128xf32, #tpu.memory_space<vmem>>, vector<16x128xf32>
    %cst = arith.constant 0.000000e+00 : f32
    %1 = vector.broadcast %cst : f32 to vector<16x128xf32>
    %2 = arith.maximumf %0, %1 : vector<16x128xf32>
    %3 = arith.truncf %2 : vector<16x128xf32> to vector<16x128xbf16>
    %c0_1 = arith.constant 0 : index
    %c0_2 = arith.constant 0 : index
    %4 = vector.load %arg2[%c0_1, %c0_2] : memref<128x128xbf16, #tpu.memory_space<vmem>>, vector<128x128xbf16>
    %cst_3 = arith.constant dense<0.000000e+00> : vector<16x128xf32>
    %5 = tpu.matmul %3, %4, %cst_3 {dimension_numbers = #tpu.dot_dimension_numbers<[1], [0], [0], [1], [0, 0, 1, 1], [], []>} : vector<16x128xbf16>, vector<128x128xbf16>, vector<16x128xf32> -> vector<16x128xf32>
    %c0_4 = arith.constant 0 : index
    %c0_5 = arith.constant 0 : index
    %6 = vector.load %arg3[%c0_4, %c0_5] : memref<1x128xf32, #tpu.memory_space<vmem>>, vector<1x128xf32>
    %7 = vector.broadcast %6 : vector<1x128xf32> to vector<16x128xf32>
    %8 = arith.addf %5, %7 : vector<16x128xf32>
    %cst_6 = arith.constant 0.000000e+00 : f32
    %9 = vector.broadcast %cst_6 : f32 to vector<16x128xf32>
    %10 = arith.maximumf %8, %9 : vector<16x128xf32>
    %11 = arith.truncf %10 : vector<16x128xf32> to vector<16x128xbf16>
    %c0_7 = arith.constant 0 : index
    %c0_8 = arith.constant 0 : index
    %12 = vector.load %arg4[%c0_7, %c0_8] : memref<128x128xbf16, #tpu.memory_space<vmem>>, vector<128x128xbf16>
    %cst_9 = arith.constant dense<0.000000e+00> : vector<16x128xf32>
    %13 = tpu.matmul %11, %12, %cst_9 {dimension_numbers = #tpu.dot_dimension_numbers<[1], [0], [0], [1], [0, 0, 1, 1], [], []>} : vector<16x128xbf16>, vector<128x128xbf16>, vector<16x128xf32> -> vector<16x128xf32>
    %c0_10 = arith.constant 0 : index
    %c0_11 = arith.constant 0 : index
    %14 = vector.load %arg5[%c0_10, %c0_11] : memref<1x128xf32, #tpu.memory_space<vmem>>, vector<1x128xf32>
    %15 = vector.broadcast %14 : vector<1x128xf32> to vector<16x128xf32>
    %16 = arith.addf %13, %15 : vector<16x128xf32>
    %17 = arith.truncf %0 : vector<16x128xf32> to vector<16x128xbf16>
    %c0_12 = arith.constant 0 : index
    %c0_13 = arith.constant 0 : index
    %18 = vector.load %arg6[%c0_12, %c0_13] : memref<128x128xbf16, #tpu.memory_space<vmem>>, vector<128x128xbf16>
    %cst_14 = arith.constant dense<0.000000e+00> : vector<16x128xf32>
    %19 = tpu.matmul %17, %18, %cst_14 {dimension_numbers = #tpu.dot_dimension_numbers<[1], [0], [0], [1], [0, 0, 1, 1], [], []>} : vector<16x128xbf16>, vector<128x128xbf16>, vector<16x128xf32> -> vector<16x128xf32>
    %20 = arith.addf %16, %19 : vector<16x128xf32>
    %c0_15 = arith.constant 0 : index
    %c0_16 = arith.constant 0 : index
    %21 = vector.load %arg7[%c0_15, %c0_16] : memref<16x128xf32, #tpu.memory_space<vmem>>, vector<16x128xf32>
    tpu.vector_store %arg7[%c0_15, %c0_16], %20 {strides = array<i32>} : memref<16x128xf32, #tpu.memory_space<vmem>>, vector<16x128xf32>,
    return
  }
  func.func @transform_0(%arg0: i32) -> (i32, i32) {
    %c0_i32 = arith.constant 0 : i32
    %c0_i32_0 = arith.constant 0 : i32
    return %arg0, %c0_i32 : i32, i32
  }
  func.func @transform_1(%arg0: i32) -> (i32, i32) {
    %c0_i32 = arith.constant 0 : i32
    %c0_i32_0 = arith.constant 0 : i32
    %c0_i32_1 = arith.constant 0 : i32
    return %c0_i32, %c0_i32_0 : i32, i32
  }
  func.func @transform_2(%arg0: i32) -> (i32, i32) {
    %c0_i32 = arith.constant 0 : i32
    %c0_i32_0 = arith.constant 0 : i32
    %c0_i32_1 = arith.constant 0 : i32
    return %c0_i32, %c0_i32_0 : i32, i32
  }
  func.func @transform_3(%arg0: i32) -> (i32, i32) {
    %c0_i32 = arith.constant 0 : i32
    %c0_i32_0 = arith.constant 0 : i32
    %c0_i32_1 = arith.constant 0 : i32
    return %c0_i32, %c0_i32_0 : i32, i32
  }
  func.func @transform_4(%arg0: i32) -> (i32, i32) {
    %c0_i32 = arith.constant 0 : i32
    %c0_i32_0 = arith.constant 0 : i32
    %c0_i32_1 = arith.constant 0 : i32
    return %c0_i32, %c0_i32_0 : i32, i32
  }
  func.func @transform_5(%arg0: i32) -> (i32, i32) {
    %c0_i32 = arith.constant 0 : i32
    %c0_i32_0 = arith.constant 0 : i32
    %c0_i32_1 = arith.constant 0 : i32
    return %c0_i32, %c0_i32_0 : i32, i32
  }
  func.func @transform_6(%arg0: i32) -> (i32, i32) {
    %c0_i32 = arith.constant 0 : i32
    %c0_i32_0 = arith.constant 0 : i32
    return %arg0, %c0_i32 : i32, i32
  }
}

</mosaic_0001>

<bundles_post_ra>
// kernel: _forward_impl.1
= control target key start
LH: loop header
LB: loop body
LE: loop exit
PB: predicated region body
PF: predicated region fallthrough
CT: control target
= control target key end

     0   :  { %11 = vsyncpa [#allocation3], 0  ;;  %s775_s0 = inlined_call_operand.vmem [shape: f32[16,128], index: 0, kind: input, shape index: {}]   ;;  %s776_s1 = inlined_call_operand.hbm [shape: bf16[128,128], index: 1, kind: input, shape index: {}]   ;;  %s777_s2 = inlined_call_operand.vmem [shape: f32[1,128], index: 2, kind: input, shape index: {}]   ;;  %s778_s3 = inlined_call_operand.hbm [shape: bf16[128,128], index: 3, kind: input, shape index: {}]   ;;  %s779_s4 = inlined_call_operand.vmem [shape: f32[1,128], index: 4, kind: input, shape index: {}]   ;;  %s780_s5 = inlined_call_operand.hbm [shape: bf16[128,128], index: 5, kind: input, shape index: {}]   ;;  %s781_s6 = inlined_call_operand.vmem [shape: f32[16,128], index: 6, kind: output, shape index: {}]  }
   0x1   :  { %12 = vsyncpa [#allocation5], 0  ;;  %s633_s21 = smov [#allocation4]   ;;  %s634_s23 = smov [#allocation2]  }
   0x2   :  { %s34_s22 = sshll.u32 %s633_s21, 4  ;;  %s20_s24 = sshll.u32 %s634_s23, 4  ;;  %s35_s22 = int_to_ptr.vmem [resolvable:$true] %s34_s22  ;;  %s675_s24 = int_to_ptr.vmem [resolvable:$true] %s20_s24 }
   0x3   :  { %s563_s27 = scalar_lea.hbm %s778_s3, 1024 }
   0x4   :  { %p564_p0 = scmp.ne.s32.totalorder %s778_s3, %s563_s27  ;;  %p567_p1 = scmp.lt.u32.totalorder %s563_s27, %s778_s3 }
   0x6   :  { %p569_p2 = pnand %p567_p1, %p564_p0 }
   0x8   :  { %572 = shalt.err (!%p569_p2)
}
   0x9   :  { %s573_s8 = scalar_lea.vmem %s35_s22, 1024  ;;  %p578_p4 = scmp.lt.s32.totalorder %s35_s22, %s35_s22 }
   0xa   :  { %p574_p3 = scmp.ne.s32.totalorder %s35_s22, %s573_s8  ;;  %p579_p5 = scmp.lt.s32.totalorder %s573_s8, %s573_s8 }
   0xc   :  { %p580_p6 = por %p579_p5, %p578_p4 }
   0xe   :  { %p581_p7 = pnand %p580_p6, %p574_p3 }
  0x10   :  { %584 = shalt.err (!%p581_p7)
}
  0x11   :  { %s635_s9 = smov 64   ;;  %s636_s10 = smov 4  }
  0x12   :  { %40 = dma.hbm_to_vmem [thread:$0]  %s778_s3, 1024, %s35_s22, [#allocation5], %s635_s9, %s635_s9, %s636_s10  }
  0x13   :  { %s585_s15 = scalar_lea.hbm %s776_s1, 1024 }
  0x14   :  { %p586_p8 = scmp.ne.s32.totalorder %s776_s1, %s585_s15  ;;  %p589_p9 = scmp.lt.u32.totalorder %s585_s15, %s776_s1 }
  0x16   :  { %p591_p10 = pnand %p589_p9, %p586_p8 }
  0x18   :  { %594 = shalt.err (!%p591_p10)
}
  0x19   :  { %s595_s20 = scalar_lea.vmem %s675_s24, 1024  ;;  %p600_p12 = scmp.lt.s32.totalorder %s675_s24, %s675_s24 }
  0x1a   :  { %p596_p11 = scmp.ne.s32.totalorder %s675_s24, %s595_s20  ;;  %p601_p13 = scmp.lt.s32.totalorder %s595_s20, %s595_s20 }
  0x1c   :  { %p602_p0 = por %p601_p13, %p600_p12 }
  0x1e   :  { %p603_p1 = pnand %p602_p0, %p596_p11 }
  0x20   :  { %606 = shalt.err (!%p603_p1)
}
  0x21   :  { %26 = dma.hbm_to_vmem [thread:$0]  %s776_s1, 1024, %s675_s24, [#allocation3], %s635_s9, %s635_s9, %s636_s10  }
  0x22   :  { %s637_s22 = smov [#allocation6]   ;;  %s607_s27 = scalar_lea.hbm %s780_s5, 1024 }
  0x23   :  { %s48_s23 = sshll.u32 %s637_s22, 4  ;;  %p608_p2 = scmp.ne.s32.totalorder %s780_s5, %s607_s27  ;;  %s49_s23 = int_to_ptr.vmem [resolvable:$true] %s48_s23 }
  0x24   :  { %p611_p3 = scmp.lt.u32.totalorder %s607_s27, %s780_s5 }
  0x26   :  { %p613_p4 = pnand %p611_p3, %p608_p2 }
  0x28   :  { %616 = shalt.err (!%p613_p4)
}
  0x29   :  { %s617_s8 = scalar_lea.vmem %s49_s23, 1024  ;;  %p622_p6 = scmp.lt.s32.totalorder %s49_s23, %s49_s23 }
  0x2a   :  { %p618_p5 = scmp.ne.s32.totalorder %s49_s23, %s617_s8  ;;  %p623_p7 = scmp.lt.s32.totalorder %s617_s8, %s617_s8 }
  0x2c   :  { %p624_p8 = por %p623_p7, %p622_p6 }
  0x2e   :  { %p625_p9 = pnand %p624_p8, %p618_p5 }
  0x30   :  { %628 = shalt.err (!%p625_p9)
}
  0x31   :  { %54 = dma.hbm_to_vmem [thread:$0]  %s780_s5, 1024, %s49_s23, [#allocation5], %s635_s9, %s635_s9, %s636_s10  }
  0x32   :  { %629 = dma.done.wait [#allocation3], 1024  }
  0x33   :  { %630 = vsyncadd [#allocation3], 4294966272 }
  0x34   :  { %631 = dma.done.wait [#allocation5], 2048  }
  0x35   :  { %632 = vsyncadd [#allocation5], 4294965248  ;;  %v638_v0 = vmov 0.0   ;;  %vm639_vm0 = vmmov 0   ;;  %v539_v1 = vld [vmem:[#allocation2] sm:$0xff]   ;;  %v540_v2 = vld [vmem:[#allocation2 + $0x8] sm:$0xff]  }
  0x36   :  { %466 = vmatprep.subr.bf16.mxu0 %v638_v0  ;;  %482 = vmatprep.mubr.msk.bf16.mxu0 %vm639_vm0, %v638_v0  ;;  %v541_v3 = vld [vmem:[#allocation2 + $0x10] sm:$0xff]   ;;  %v542_v4 = vld [vmem:[#allocation2 + $0x18] sm:$0xff]   ;;  %v547_v5 = vld [vmem:[#allocation4] sm:$0xff]  }
  0x37   :  { %486 = vmatprep.subr.bf16.mxu1 %v638_v0  ;;  %502 = vmatprep.mubr.msk.bf16.mxu1 %vm639_vm0, %v638_v0  ;;  %v548_v6 = vld [vmem:[#allocation4 + $0x8] sm:$0xff]   ;;  %v543_v7 = vld [vmem:[#allocation2 + $0x20] sm:$0xff]   ;;  %v549_v8 = vld [vmem:[#allocation4 + $0x10] sm:$0xff]  }
  0x38   :  { %467 = vmatpush3.bf16.msra.mxu0 %v539_v1  ;;  %487 = vmatpush3.bf16.msra.mxu1 %v547_v5  ;;  %v544_v9 = vld [vmem:[#allocation2 + $0x28] sm:$0xff]   ;;  %v550_v10 = vld [vmem:[#allocation4 + $0x18] sm:$0xff]   ;;  %v545_v11 = vld [vmem:[#allocation2 + $0x30] sm:$0xff]  }
  0x39   :  { %468 = vmatprep.subr.bf16.mxu0 %v638_v0  ;;  %488 = vmatprep.subr.bf16.mxu1 %v638_v0  ;;  %v65_v12 = vld [vmem:[%s775_s0] sm:$0xff]  ;;  %v66_v13 = vld [vmem:[%s775_s0 + $0x8] sm:$0xff]  ;;  %v546_v17 = vld [vmem:[#allocation2 + $0x38] sm:$0xff]  }
  0x3a   :  { %v551_v14 = vld [vmem:[#allocation4 + $0x20] sm:$0xff]   ;;  %v67_v15 = vmax.f32 %v65_v12, 0.0  ;;  %v68_v16 = vmax.f32 %v66_v13, 0.0  ;;  %v552_v18 = vld [vmem:[#allocation4 + $0x28] sm:$0xff]   ;;  %v553_v20 = vld [vmem:[#allocation4 + $0x30] sm:$0xff]   ;;  %v297_v40 = vpack.c.bf16 %v66_v13, %v65_v12 }
  0x3b   :  { %v554_v21 = vld [vmem:[#allocation4 + $0x38] sm:$0xff]   ;;  %v413_v22 = vld [vmem:[%s777_s2] ss:$0 sm:$0xff]  ;;  %v556_v33 = vld [vmem:[#allocation6 + $0x8] sm:$0xff]  }
  0x3c   :  { %469 = vmatpush3.bf16.msra.mxu0 %v540_v2  ;;  %489 = vmatpush3.bf16.msra.mxu1 %v548_v6  ;;  %v69_v19 = vpack.c.bf16 %v68_v16, %v67_v15  ;;  %v555_v31 = vld [vmem:[#allocation6] sm:$0xff]   ;;  %v557_v34 = vld [vmem:[#allocation6 + $0x10] sm:$0xff]   ;;  %v558_v35 = vld [vmem:[#allocation6 + $0x18] sm:$0xff]  }
  0x3d   :  { %470 = vmatprep.subr.bf16.mxu0 %v638_v0  ;;  %490 = vmatprep.subr.bf16.mxu1 %v638_v0  ;;  %v559_v36 = vld [vmem:[#allocation6 + $0x20] sm:$0xff]   ;;  %v560_v37 = vld [vmem:[#allocation6 + $0x28] sm:$0xff]   ;;  %v561_v38 = vld [vmem:[#allocation6 + $0x30] sm:$0xff]  }
  0x3e   :  { %v562_v39 = vld [vmem:[#allocation6 + $0x38] sm:$0xff]   ;;  %v422_v41 = vld [vmem:[%s779_s4] ss:$0 sm:$0xff] }
  0x40   :  { %471 = vmatpush3.bf16.msra.mxu0 %v541_v3  ;;  %491 = vmatpush3.bf16.msra.mxu1 %v549_v8 }
  0x41   :  { %472 = vmatprep.subr.bf16.mxu0 %v638_v0  ;;  %492 = vmatprep.subr.bf16.mxu1 %v638_v0 }
  0x44   :  { %473 = vmatpush3.bf16.msra.mxu0 %v542_v4  ;;  %493 = vmatpush3.bf16.msra.mxu1 %v550_v10 }
  0x45   :  { %474 = vmatprep.subr.bf16.mxu0 %v638_v0  ;;  %494 = vmatprep.subr.bf16.mxu1 %v638_v0 }
  0x48   :  { %475 = vmatpush3.bf16.msra.mxu0 %v543_v7  ;;  %495 = vmatpush3.bf16.msra.mxu1 %v551_v14 }
  0x49   :  { %476 = vmatprep.subr.bf16.mxu0 %v638_v0  ;;  %496 = vmatprep.subr.bf16.mxu1 %v638_v0 }
  0x4c   :  { %477 = vmatpush3.bf16.msra.mxu0 %v544_v9  ;;  %497 = vmatpush3.bf16.msra.mxu1 %v552_v18 }
  0x4d   :  { %478 = vmatprep.subr.bf16.mxu0 %v638_v0  ;;  %498 = vmatprep.subr.bf16.mxu1 %v638_v0 }
  0x50   :  { %479 = vmatpush3.bf16.msra.mxu0 %v545_v11  ;;  %499 = vmatpush3.bf16.msra.mxu1 %v553_v20 }
  0x51   :  { %480 = vmatprep.subr.bf16.mxu0 %v638_v0  ;;  %500 = vmatprep.subr.bf16.mxu1 %v638_v0 }
  0x54   :  { %481 = vmatpush3.bf16.msra.mxu0 %v546_v17  ;;  %501 = vmatpush3.bf16.msra.mxu1 %v554_v21 }
  0x55   :  { %506 = vmatprep.subr.bf16.mxu1 %v638_v0 }
  0x57   :  { %483 = vmatmul.mubr.bf16.vlgmr.msra.gmra.mrb[0].mxu0 %v69_v19 }
 0x12a   :  { %v175_v23 = vpop.f32.mrb[0].mxu0 }
 0x12b   :  { %v176_v24 = vadd.f32 %v413_v22, %v175_v23  ;;  %v484_v25 = vpop.f32.mrb[1].mxu0 }
 0x12c   :  { %v178_v26 = vpop.f32.mrb[2].mxu0 }
 0x12d   :  { %v179_v27 = vadd.f32 %v413_v22, %v178_v26  ;;  %v485_v28 = vpop.f32.mrb[3].mxu0  ;;  %v182_v29 = vmax.f32 %v176_v24, 0.0 }
 0x12f   :  { %v183_v30 = vmax.f32 %v179_v27, 0.0 }
 0x131   :  { %v184_v32 = vpack.c.bf16 %v183_v30, %v182_v29 }
 0x133   :  { %503 = vmatmul.mubr.bf16.vlgmr.msra.gmra.mrb[0].mxu1 %v184_v32 }
 0x134   :  { %507 = vmatpush3.bf16.msra.mxu1 %v555_v31  ;;  %522 = vmatprep.mubr.msk.bf16.mxu1 %vm639_vm0, %v638_v0 }
 0x135   :  { %508 = vmatprep.subr.bf16.mxu1 %v638_v0 }
 0x138   :  { %509 = vmatpush3.bf16.msra.mxu1 %v556_v33 }
 0x139   :  { %510 = vmatprep.subr.bf16.mxu1 %v638_v0 }
 0x13c   :  { %511 = vmatpush3.bf16.msra.mxu1 %v557_v34 }
 0x13d   :  { %512 = vmatprep.subr.bf16.mxu1 %v638_v0 }
 0x140   :  { %513 = vmatpush3.bf16.msra.mxu1 %v558_v35 }
 0x141   :  { %514 = vmatprep.subr.bf16.mxu1 %v638_v0 }
 0x144   :  { %515 = vmatpush3.bf16.msra.mxu1 %v559_v36 }
 0x145   :  { %516 = vmatprep.subr.bf16.mxu1 %v638_v0 }
 0x148   :  { %517 = vmatpush3.bf16.msra.mxu1 %v560_v37 }
 0x149   :  { %518 = vmatprep.subr.bf16.mxu1 %v638_v0 }
 0x14c   :  { %519 = vmatpush3.bf16.msra.mxu1 %v561_v38 }
 0x14d   :  { %520 = vmatprep.subr.bf16.mxu1 %v638_v0 }
 0x150   :  { %521 = vmatpush3.bf16.msra.mxu1 %v562_v39 }
 0x153   :  { %523 = vmatmul.mubr.bf16.vlgmr.msra.gmra.mrb[0].mxu1 %v297_v40 }
 0x226   :  { %v396_v42 = vpop.f32.mrb[0].mxu1 }
 0x227   :  { %v526_v43 = vadd.f32 %v422_v41, %v396_v42  ;;  %v524_v44 = vpop.f32.mrb[1].mxu1 }
 0x228   :  { %v399_v45 = vpop.f32.mrb[2].mxu1 }
 0x229   :  { %405 = vst [vmem:[%s781_s6] sm:$0xff] %v526_v43  ;;  %v527_v46 = vadd.f32 %v422_v41, %v399_v45  ;;  %v525_v47 = vpop.f32.mrb[3].mxu1 }
 0x22b   :  { %406 = vst [vmem:[%s781_s6 + $0x8] sm:$0xff] %v527_v46 }
 0x22c   :  { %411 = vsyncpa [#allocation3], 1 }
 0x22d   :  { %412 = vsyncpa [#allocation5], 1 }

</bundles_post_ra>
